<compile_context>
chip_gen: v5e
topology: v5e:2x2
jax: 0.10.0
libtpu: 0.0.40
codegen_flags: <defaults>
</compile_context>

<pallas_src>
import jax
import jax.numpy as jnp
from jax.experimental import pallas as pl
from jax.experimental.pallas import tpu as pltpu

LANE = 128      # TPU vreg lane width (last dim)
SUBLANE = 8     # TPU vreg sublane depth for f32 (second-to-last dim)


def _round_up(n, m):
    return (n + m - 1) // m * m


# --------------------------------------------------------------------------- kernel
def _mlp_kernel(x_ref, w1_ref, b1_ref, w2_ref, b2_ref, w3_ref, b3_ref, o_ref):
    """Fused 3-layer MLP on one batch tile: 3 MXU matmuls (f32 accumulation) with
    f32 bias-add + ReLU epilogues on the VPU. Weights may be bf16; activations are
    cast to the weight dtype right before each matmul so the MXU sees its native
    datapath, while all elementwise math stays in f32."""
    wdt = w1_ref.dtype
    x = x_ref[...].astype(wdt)

    h1 = jnp.dot(x, w1_ref[...], preferred_element_type=jnp.float32) + b1_ref[...]
    h1 = jnp.maximum(h1, 0.0).astype(wdt)

    h2 = jnp.dot(h1, w2_ref[...], preferred_element_type=jnp.float32) + b2_ref[...]
    h2 = jnp.maximum(h2, 0.0).astype(wdt)

    out = jnp.dot(h2, w3_ref[...], preferred_element_type=jnp.float32) + b3_ref[...]
    o_ref[...] = out.astype(o_ref.dtype)


# ----------------------------------------------------------------------- parameters
def init_params(key, input_size, hidden_size, output_size):
    """Deterministic init mimicking PyTorch nn.Linear (uniform +/- 1/sqrt(fan_in)).
    Weights stored as (in_features, out_features); biases as (1, out_features)."""
    def linear_init(k, fan_in, fan_out):
        kw, kb = jax.random.split(k)
        bound = 1.0 / jnp.sqrt(fan_in)
        w = jax.random.uniform(kw, (fan_in, fan_out), jnp.float32, -bound, bound)
        b = jax.random.uniform(kb, (1, fan_out), jnp.float32, -bound, bound)
        return w, b

    k1, k2, k3 = jax.random.split(key, 3)
    w1, b1 = linear_init(k1, input_size, hidden_size)
    w2, b2 = linear_init(k2, hidden_size, hidden_size)
    w3, b3 = linear_init(k3, hidden_size, output_size)
    return {"w1": w1, "b1": b1, "w2": w2, "b2": b2, "w3": w3, "b3": b3}


def prepare_params(params, compute_dtype=jnp.float32):
    """One-time zero-padding of all feature dims to hardware-native widths:
    out-feature (lane) dims -> multiple of 128, w1 in-feature dim -> multiple of 8.
    Weights are cast to compute_dtype (use jnp.bfloat16 on v6e/v7x); biases stay
    f32 because the bias-add/ReLU epilogue runs in f32."""
    def pad2(a, rows, cols):
        return jnp.pad(a, ((0, rows - a.shape[0]), (0, cols - a.shape[1])))

    in_size, hidden = params["w1"].shape
    out_size = params["w3"].shape[1]
    in_p = _round_up(in_size, SUBLANE)
    hid_p = _round_up(hidden, LANE)
    out_p = _round_up(out_size, LANE)

    padded = {
        "w1": pad2(params["w1"], in_p, hid_p).astype(compute_dtype),
        "b1": pad2(params["b1"], 1, hid_p).astype(jnp.float32),
        "w2": pad2(params["w2"], hid_p, hid_p).astype(compute_dtype),
        "b2": pad2(params["b2"], 1, hid_p).astype(jnp.float32),
        "w3": pad2(params["w3"], hid_p, out_p).astype(compute_dtype),
        "b3": pad2(params["b3"], 1, out_p).astype(jnp.float32),
    }
    meta = {"input_size": in_size, "out_size": out_size}
    return padded, meta


# -------------------------------------------------------------------------- forward
def agent_network_forward(x, padded_params, meta, *, batch_tile=None):
    """x: (B, input_size) f32. padded_params/meta from prepare_params().
    Returns (B, output_size) Q-values in x.dtype."""
    p = padded_params
    B, in_size = x.shape
    in_p, hid_p = p["w1"].shape
    out_p = p["w3"].shape[1]
    out_size = meta["out_size"]

    # Batch tiling: large sublane-aligned row tiles; weights stay resident across steps.
    if batch_tile is None:
        batch_tile = min(_round_up(B, SUBLANE), 256)
    B_pad = _round_up(B, batch_tile)

    xp = x
    if (B_pad != B) or (in_p != in_size):
        xp = jnp.pad(x, ((0, B_pad - B), (0, in_p - in_size)))

    grid = (B_pad // batch_tile,)

    def resident(shape):  # weights/biases: same block every grid step -> stays in VMEM
        return pl.BlockSpec(shape, lambda i: (0, 0))

    flops = 2 * B_pad * (in_p * hid_p + hid_p * hid_p + hid_p * out_p)
    bytes_accessed = (
        xp.size * xp.dtype.itemsize
        + sum(v.size * v.dtype.itemsize for v in p.values())
        + B_pad * out_p * x.dtype.itemsize
    )

    out_padded = pl.pallas_call(
        _mlp_kernel,
        out_shape=jax.ShapeDtypeStruct((B_pad, out_p), x.dtype),
        grid_spec=pltpu.PrefetchScalarGridSpec(
            num_scalar_prefetch=0,
            grid=grid,
            in_specs=[
                pl.BlockSpec((batch_tile, in_p), lambda i: (i, 0)),
                resident(p["w1"].shape), resident(p["b1"].shape),
                resident(p["w2"].shape), resident(p["b2"].shape),
                resident(p["w3"].shape), resident(p["b3"].shape),
            ],
            out_specs=pl.BlockSpec((batch_tile, out_p), lambda i: (i, 0)),
        ),
        compiler_params=pltpu.CompilerParams(
            # Batch axis is independent -> "parallel" lets v7x shard steps over both TCs.
            dimension_semantics=("parallel",),
        ),
        cost_estimate=pl.CostEstimate(
            flops=flops, transcendentals=0, bytes_accessed=bytes_accessed
        ),
    )(xp, p["w1"], p["b1"], p["w2"], p["b2"], p["w3"], p["b3"])

    # Slice the lane/batch padding back off (lane-dense store happened inside the kernel).
    return out_padded[:B, :out_size]


# ------------------------------------------------------------------------ reference
def reference_forward(x, p):
    h1 = jnp.maximum(x @ p["w1"] + p["b1"], 0.0)
    h2 = jnp.maximum(h1 @ p["w2"] + p["b2"], 0.0)
    return h2 @ p["w3"] + p["b3"]


if __name__ == "__main__":
    key = jax.random.PRNGKey(0)
    kx, kp, kx2 = jax.random.split(key, 3)

    input_size = 16    # state / observation size
    hidden_size = 32
    output_size = 4    # number of actions (Q-values)

    params = init_params(kp, input_size, hidden_size, output_size)

    # ---- f32 path (bit-accurate vs reference) ----
    padded_f32, meta = prepare_params(params, compute_dtype=jnp.float32)

    x = jax.random.normal(kx, (8, input_size), jnp.float32)
    out = jax.block_until_ready(agent_network_forward(x, padded_f32, meta))
    ref = reference_forward(x, params)
    assert out.shape == (8, output_size)
    assert jnp.allclose(out, ref, atol=1e-5, rtol=1e-5), "f32 Pallas output mismatch"

    # ---- larger, non-multiple batch: exercises batch padding + multi-step grid ----
    x2 = jax.random.normal(kx2, (300, input_size), jnp.float32)
    out2 = jax.block_until_ready(agent_network_forward(x2, padded_f32, meta))
    ref2 = reference_forward(x2, params)
    assert out2.shape == (300, output_size)
    assert jnp.allclose(out2, ref2, atol=1e-5, rtol=1e-5), "batched Pallas output mismatch"

    # ---- bf16 weights/activations (native MXU datapath on v6e/v7x), f32 accumulation ----
    padded_bf16, meta_b = prepare_params(params, compute_dtype=jnp.bfloat16)
    out_b = jax.block_until_ready(agent_network_forward(x, padded_bf16, meta_b))
    assert out_b.shape == (8, output_size)
    assert jnp.allclose(out_b, ref, atol=1e-1, rtol=1e-1), "bf16 Pallas output mismatch"

    print("KERNEL_OK")
</pallas_src>

<mosaic_0001>
module attributes {stable_mosaic.version = 11 : i64} {
  func.func @_mlp_kernel(%arg0: i32, %arg1: memref<8x16xf32, #tpu.memory_space<vmem>>, %arg2: memref<16x128xf32, #tpu.memory_space<vmem>>, %arg3: memref<1x128xf32, #tpu.memory_space<vmem>>, %arg4: memref<128x128xf32, #tpu.memory_space<vmem>>, %arg5: memref<1x128xf32, #tpu.memory_space<vmem>>, %arg6: memref<128x128xf32, #tpu.memory_space<vmem>>, %arg7: memref<1x128xf32, #tpu.memory_space<vmem>>, %arg8: memref<8x128xf32, #tpu.memory_space<vmem>>) attributes {dimension_semantics = [#tpu.dimension_semantics<parallel>], iteration_bounds = array<i64: 1>, scalar_prefetch = 0 : i64, scratch_operands = 0 : i64, tpu.core_type = #tpu.core_type<tc>, window_params = [{transform_indices = @transform_0, window_bounds = array<i64: 8, 16>}, {pipeline_mode = #tpu.pipeline_mode<synchronous>, transform_indices = @transform_1, window_bounds = array<i64: 16, 128>}, {pipeline_mode = #tpu.pipeline_mode<synchronous>, transform_indices = @transform_2, window_bounds = array<i64: 1, 128>}, {pipeline_mode = #tpu.pipeline_mode<synchronous>, transform_indices = @transform_3, window_bounds = array<i64: 128, 128>}, {pipeline_mode = #tpu.pipeline_mode<synchronous>, transform_indices = @transform_4, window_bounds = array<i64: 1, 128>}, {pipeline_mode = #tpu.pipeline_mode<synchronous>, transform_indices = @transform_5, window_bounds = array<i64: 128, 128>}, {pipeline_mode = #tpu.pipeline_mode<synchronous>, transform_indices = @transform_6, window_bounds = array<i64: 1, 128>}, {transform_indices = @transform_7, window_bounds = array<i64: 8, 128>}]} {
    %c0 = arith.constant 0 : index
    %c0_0 = arith.constant 0 : index
    %0 = vector.load %arg1[%c0, %c0_0] : memref<8x16xf32, #tpu.memory_space<vmem>>, vector<8x16xf32>
    %c0_1 = arith.constant 0 : index
    %c0_2 = arith.constant 0 : index
    %1 = vector.load %arg2[%c0_1, %c0_2] : memref<16x128xf32, #tpu.memory_space<vmem>>, vector<16x128xf32>
    %cst = arith.constant dense<0.000000e+00> : vector<8x128xf32>
    %2 = tpu.matmul %0, %1, %cst {dimension_numbers = #tpu.dot_dimension_numbers<[1], [0], [0], [1], [0, 0, 1, 1], [], []>} : vector<8x16xf32>, vector<16x128xf32>, vector<8x128xf32> -> vector<8x128xf32>
    %c0_3 = arith.constant 0 : index
    %c0_4 = arith.constant 0 : index
    %3 = vector.load %arg3[%c0_3, %c0_4] : memref<1x128xf32, #tpu.memory_space<vmem>>, vector<1x128xf32>
    %4 = vector.broadcast %3 : vector<1x128xf32> to vector<8x128xf32>
    %5 = arith.addf %2, %4 : vector<8x128xf32>
    %cst_5 = arith.constant 0.000000e+00 : f32
    %6 = vector.broadcast %cst_5 : f32 to vector<8x128xf32>
    %7 = arith.maximumf %5, %6 : vector<8x128xf32>
    %c0_6 = arith.constant 0 : index
    %c0_7 = arith.constant 0 : index
    %8 = vector.load %arg4[%c0_6, %c0_7] : memref<128x128xf32, #tpu.memory_space<vmem>>, vector<128x128xf32>
    %cst_8 = arith.constant dense<0.000000e+00> : vector<8x128xf32>
    %9 = tpu.matmul %7, %8, %cst_8 {dimension_numbers = #tpu.dot_dimension_numbers<[1], [0], [0], [1], [0, 0, 1, 1], [], []>} : vector<8x128xf32>, vector<128x128xf32>, vector<8x128xf32> -> vector<8x128xf32>
    %c0_9 = arith.constant 0 : index
    %c0_10 = arith.constant 0 : index
    %10 = vector.load %arg5[%c0_9, %c0_10] : memref<1x128xf32, #tpu.memory_space<vmem>>, vector<1x128xf32>
    %11 = vector.broadcast %10 : vector<1x128xf32> to vector<8x128xf32>
    %12 = arith.addf %9, %11 : vector<8x128xf32>
    %cst_11 = arith.constant 0.000000e+00 : f32
    %13 = vector.broadcast %cst_11 : f32 to vector<8x128xf32>
    %14 = arith.maximumf %12, %13 : vector<8x128xf32>
    %c0_12 = arith.constant 0 : index
    %c0_13 = arith.constant 0 : index
    %15 = vector.load %arg6[%c0_12, %c0_13] : memref<128x128xf32, #tpu.memory_space<vmem>>, vector<128x128xf32>
    %cst_14 = arith.constant dense<0.000000e+00> : vector<8x128xf32>
    %16 = tpu.matmul %14, %15, %cst_14 {dimension_numbers = #tpu.dot_dimension_numbers<[1], [0], [0], [1], [0, 0, 1, 1], [], []>} : vector<8x128xf32>, vector<128x128xf32>, vector<8x128xf32> -> vector<8x128xf32>
    %c0_15 = arith.constant 0 : index
    %c0_16 = arith.constant 0 : index
    %17 = vector.load %arg7[%c0_15, %c0_16] : memref<1x128xf32, #tpu.memory_space<vmem>>, vector<1x128xf32>
    %18 = vector.broadcast %17 : vector<1x128xf32> to vector<8x128xf32>
    %19 = arith.addf %16, %18 : vector<8x128xf32>
    %c0_17 = arith.constant 0 : index
    %c0_18 = arith.constant 0 : index
    %20 = vector.load %arg8[%c0_17, %c0_18] : memref<8x128xf32, #tpu.memory_space<vmem>>, vector<8x128xf32>
    tpu.vector_store %arg8[%c0_17, %c0_18], %19 {strides = array<i32>} : memref<8x128xf32, #tpu.memory_space<vmem>>, vector<8x128xf32>,
    return
  }
  func.func @transform_0(%arg0: i32) -> (i32, i32) {
    %c0_i32 = arith.constant 0 : i32
    %c0_i32_0 = arith.constant 0 : i32
    return %arg0, %c0_i32 : i32, i32
  }
  func.func @transform_1(%arg0: i32) -> (i32, i32) {
    %c0_i32 = arith.constant 0 : i32
    %c0_i32_0 = arith.constant 0 : i32
    %c0_i32_1 = arith.constant 0 : i32
    return %c0_i32, %c0_i32_0 : i32, i32
  }
  func.func @transform_2(%arg0: i32) -> (i32, i32) {
    %c0_i32 = arith.constant 0 : i32
    %c0_i32_0 = arith.constant 0 : i32
    %c0_i32_1 = arith.constant 0 : i32
    return %c0_i32, %c0_i32_0 : i32, i32
  }
  func.func @transform_3(%arg0: i32) -> (i32, i32) {
    %c0_i32 = arith.constant 0 : i32
    %c0_i32_0 = arith.constant 0 : i32
    %c0_i32_1 = arith.constant 0 : i32
    return %c0_i32, %c0_i32_0 : i32, i32
  }
  func.func @transform_4(%arg0: i32) -> (i32, i32) {
    %c0_i32 = arith.constant 0 : i32
    %c0_i32_0 = arith.constant 0 : i32
    %c0_i32_1 = arith.constant 0 : i32
    return %c0_i32, %c0_i32_0 : i32, i32
  }
  func.func @transform_5(%arg0: i32) -> (i32, i32) {
    %c0_i32 = arith.constant 0 : i32
    %c0_i32_0 = arith.constant 0 : i32
    %c0_i32_1 = arith.constant 0 : i32
    return %c0_i32, %c0_i32_0 : i32, i32
  }
  func.func @transform_6(%arg0: i32) -> (i32, i32) {
    %c0_i32 = arith.constant 0 : i32
    %c0_i32_0 = arith.constant 0 : i32
    %c0_i32_1 = arith.constant 0 : i32
    return %c0_i32, %c0_i32_0 : i32, i32
  }
  func.func @transform_7(%arg0: i32) -> (i32, i32) {
    %c0_i32 = arith.constant 0 : i32
    %c0_i32_0 = arith.constant 0 : i32
    return %arg0, %c0_i32 : i32, i32
  }
}

</mosaic_0001>

<bundles_post_ra>
// kernel: tpu_custom_call.1
= control target key start
LH: loop header
LB: loop body
LE: loop exit
PB: predicated region body
PF: predicated region fallthrough
CT: control target
= control target key end

     0   :  { %12 = vsyncpa [#allocation3], 0  ;;  %s431_s0 = inlined_call_operand.hbm [shape: f32[8,16], index: 0, kind: input, shape index: {}]   ;;  %s432_s1 = inlined_call_operand.hbm [shape: f32[16,128], index: 1, kind: input, shape index: {}]   ;;  %s433_s2 = inlined_call_operand.vmem [shape: f32[1,128], index: 2, kind: input, shape index: {}]   ;;  %s434_s3 = inlined_call_operand.hbm [shape: f32[128,128], index: 3, kind: input, shape index: {}]   ;;  %s435_s4 = inlined_call_operand.vmem [shape: f32[1,128], index: 4, kind: input, shape index: {}]   ;;  %s436_s5 = inlined_call_operand.hbm [shape: f32[128,128], index: 5, kind: input, shape index: {}]   ;;  %s437_s6 = inlined_call_operand.vmem [shape: f32[1,128], index: 6, kind: input, shape index: {}]   ;;  %s438_s7 = inlined_call_operand.hbm [shape: f32[8,128], index: 7, kind: output, shape index: {}]  }
   0x1   :  { %13 = vsyncpa [#allocation6], 0 }
   0x2   :  { %14 = vsyncpa [#allocation9], 0  ;;  %s31_s26 = sshll.u32 %s432_s1, 4  ;;  %s32_s26 = int_to_ptr.hbm [resolvable:$true] %s31_s26 }
   0x3   :  { %15 = vsyncpa [#allocation4], 0  ;;  %s360_s27 = smov [#allocation5]   ;;  %s21_s8 = sshll.u32 %s431_s0, 4  ;;  %s22_s8 = int_to_ptr.hbm [resolvable:$true] %s21_s8 }
   0x4   :  { %s33_s28 = sshll.u32 %s360_s27, 4  ;;  %s361_s9 = smov 128   ;;  %s34_s28 = int_to_ptr.vmem [resolvable:$true] %s33_s28 }
   0x5   :  { %s362_s10 = smov 8   ;;  %s363_s11 = smov [#allocation2]  }
   0x6   :  { %39 = dma.hbm_to_vmem [thread:$0]  %s32_s26, 256, %s34_s28, [#allocation6], %s361_s9, %s361_s9, %s362_s10  }
   0x7   :  { %s23_s12 = sshll.u32 %s363_s11, 4  ;;  %s46_s15 = sshll.u32 %s434_s3, 4  ;;  %s24_s12 = int_to_ptr.vmem [resolvable:$true] %s23_s12  ;;  %s47_s15 = int_to_ptr.hbm [resolvable:$true] %s46_s15 }
   0x8   :  { %26 = dma.hbm_to_vmem [thread:$0]  %s22_s8, 128, %s24_s12, [#allocation3]  }
   0x9   :  { %s61_s17 = sshll.u32 %s436_s5, 4  ;;  %s364_s18 = smov [#allocation7]   ;;  %s62_s17 = int_to_ptr.hbm [resolvable:$true] %s61_s17 }
   0xa   :  { %s48_s19 = sshll.u32 %s364_s18, 4  ;;  %s365_s0 = smov [#allocation8]   ;;  %s49_s19 = int_to_ptr.vmem [resolvable:$true] %s48_s19 }
   0xb   :  { %54 = dma.hbm_to_vmem [thread:$0]  %s47_s15, 2048, %s49_s19, [#allocation6], %s361_s9, %s361_s9, %s362_s10  }
   0xc   :  { %s63_s20 = sshll.u32 %s365_s0, 4  ;;  %s64_s20 = int_to_ptr.vmem [resolvable:$true] %s63_s20 }
   0xd   :  { %69 = dma.hbm_to_vmem [thread:$0]  %s62_s17, 2048, %s64_s20, [#allocation9], %s361_s9, %s361_s9, %s362_s10  }
   0xe   :  { %352 = dma.done.wait [#allocation3], 128  }
   0xf   :  { %353 = vsyncadd [#allocation3], 4294967168 }
  0x10   :  { %354 = dma.done.wait [#allocation6], 2304  }
  0x11   :  { %355 = vsyncadd [#allocation6], 4294964992 }
  0x12   :  { %356 = dma.done.wait [#allocation9], 2048  }
  0x13   :  { %357 = vsyncadd [#allocation9], 4294965248  ;;  %v90_v0 = vld [vmem:[#allocation5 + $0x8] sm:$0xff]  ;;  %v89_v1 = vld [vmem:[#allocation5] sm:$0xff]  ;;  %vm95_vm0 = vcmask 130048   ;;  %s366_s24 = smov [#allocation10]  }
  0x14   :  { %113 = vmatpush.msra.mxu0 %v90_v0  ;;  %v88_v2 = vld [vmem:[#allocation2] sm:$0xff]  ;;  %v135_v3 = vld [vmem:[#allocation7 + $0x78] sm:$0xff]  ;;  %v134_v4 = vld [vmem:[#allocation7 + $0x70] sm:$0xff]  ;;  %s207_s25 = sshll.u32 %s366_s24, 4  ;;  %s209_s28 = sshll.u32 %s438_s7, 4  ;;  %s208_s25 = int_to_ptr.vmem [resolvable:$true] %s207_s25  ;;  %s210_s28 = int_to_ptr.hbm [resolvable:$true] %s209_s28 }
  0x15   :  { %140 = vmatpush.msra.mxu1 %v135_v3  ;;  %v133_v5 = vld [vmem:[#allocation7 + $0x68] sm:$0xff]  ;;  %v132_v6 = vld [vmem:[#allocation7 + $0x60] sm:$0xff]  ;;  %v131_v7 = vld [vmem:[#allocation7 + $0x58] sm:$0xff] }
  0x16   :  { %114 = vmatpush.msra.mxu0 %v89_v1  ;;  %v130_v8 = vld [vmem:[#allocation7 + $0x50] sm:$0xff]  ;;  %v129_v9 = vld [vmem:[#allocation7 + $0x48] sm:$0xff]  ;;  %v128_v10 = vld [vmem:[#allocation7 + $0x40] sm:$0xff] }
  0x17   :  { %221 = vmatmul.msk.f32.vlgmr.msra.gmra.mxu0 %vm95_vm0, %v88_v2  ;;  %141 = vmatpush.msra.mxu1 %v134_v4  ;;  %v127_v11 = vld [vmem:[#allocation7 + $0x38] sm:$0xff]  ;;  %v126_v12 = vld [vmem:[#allocation7 + $0x30] sm:$0xff]  ;;  %v125_v13 = vld [vmem:[#allocation7 + $0x28] sm:$0xff] }
  0x18   :  { %v124_v14 = vld [vmem:[#allocation7 + $0x20] sm:$0xff]  ;;  %v123_v15 = vld [vmem:[#allocation7 + $0x18] sm:$0xff]  ;;  %v122_v16 = vld [vmem:[#allocation7 + $0x10] sm:$0xff] }
  0x19   :  { %142 = vmatpush.msra.mxu1 %v133_v5  ;;  %v121_v17 = vld [vmem:[#allocation7 + $0x8] sm:$0xff]  ;;  %v120_v18 = vld [vmem:[#allocation7] sm:$0xff]  ;;  %v176_v19 = vld [vmem:[#allocation8 + $0x78] sm:$0xff] }
  0x1a   :  { %v175_v20 = vld [vmem:[#allocation8 + $0x70] sm:$0xff]  ;;  %181 = vmatpush.msra.mxu2 %v176_v19  ;;  %v174_v21 = vld [vmem:[#allocation8 + $0x68] sm:$0xff]  ;;  %v173_v22 = vld [vmem:[#allocation8 + $0x60] sm:$0xff] }
  0x1b   :  { %143 = vmatpush.msra.mxu1 %v132_v6  ;;  %v172_v23 = vld [vmem:[#allocation8 + $0x58] sm:$0xff]  ;;  %v171_v24 = vld [vmem:[#allocation8 + $0x50] sm:$0xff]  ;;  %v170_v25 = vld [vmem:[#allocation8 + $0x48] sm:$0xff] }
  0x1c   :  { %182 = vmatpush.msra.mxu2 %v175_v20  ;;  %v169_v26 = vld [vmem:[#allocation8 + $0x40] sm:$0xff]  ;;  %v168_v27 = vld [vmem:[#allocation8 + $0x38] sm:$0xff]  ;;  %v167_v28 = vld [vmem:[#allocation8 + $0x30] sm:$0xff] }
  0x1d   :  { %144 = vmatpush.msra.mxu1 %v131_v7  ;;  %v166_v29 = vld [vmem:[#allocation8 + $0x28] sm:$0xff]  ;;  %v165_v30 = vld [vmem:[#allocation8 + $0x20] sm:$0xff]  ;;  %v164_v31 = vld [vmem:[#allocation8 + $0x18] sm:$0xff] }
  0x1e   :  { %183 = vmatpush.msra.mxu2 %v174_v21  ;;  %v229_v32 = vld [vmem:[%s433_s2] ss:$0 sm:$0xff]  ;;  %v163_v36 = vld [vmem:[#allocation8 + $0x10] sm:$0xff]  ;;  %v161_v38 = vld [vmem:[#allocation8] sm:$0xff] }
  0x1f   :  { %145 = vmatpush.msra.mxu1 %v130_v8  ;;  %v162_v37 = vld [vmem:[#allocation8 + $0x8] sm:$0xff] }
  0x20   :  { %184 = vmatpush.msra.mxu2 %v173_v22  ;;  %v230_v39 = vld [vmem:[%s435_s4] ss:$0 sm:$0xff] }
  0x21   :  { %146 = vmatpush.msra.mxu1 %v129_v9  ;;  %v231_v43 = vld [vmem:[%s437_s6] ss:$0 sm:$0xff] }
  0x22   :  { %185 = vmatpush.msra.mxu2 %v172_v23 }
  0x23   :  { %147 = vmatpush.msra.mxu1 %v128_v10 }
  0x24   :  { %186 = vmatpush.msra.mxu2 %v171_v24 }
  0x25   :  { %148 = vmatpush.msra.mxu1 %v127_v11 }
  0x26   :  { %187 = vmatpush.msra.mxu2 %v170_v25 }
  0x27   :  { %149 = vmatpush.msra.mxu1 %v126_v12 }
  0x28   :  { %188 = vmatpush.msra.mxu2 %v169_v26 }
  0x29   :  { %150 = vmatpush.msra.mxu1 %v125_v13 }
  0x2a   :  { %189 = vmatpush.msra.mxu2 %v168_v27 }
  0x2b   :  { %151 = vmatpush.msra.mxu1 %v124_v14 }
  0x2c   :  { %190 = vmatpush.msra.mxu2 %v167_v28 }
  0x2d   :  { %152 = vmatpush.msra.mxu1 %v123_v15 }
  0x2e   :  { %191 = vmatpush.msra.mxu2 %v166_v29 }
  0x2f   :  { %153 = vmatpush.msra.mxu1 %v122_v16 }
  0x30   :  { %192 = vmatpush.msra.mxu2 %v165_v30 }
  0x31   :  { %154 = vmatpush.msra.mxu1 %v121_v17 }
  0x32   :  { %193 = vmatpush.msra.mxu2 %v164_v31 }
  0x33   :  { %155 = vmatpush.msra.mxu1 %v120_v18 }
  0x34   :  { %194 = vmatpush.msra.mxu2 %v163_v36 }
  0x36   :  { %195 = vmatpush.msra.mxu2 %v162_v37 }
  0x38   :  { %196 = vmatpush.msra.mxu2 %v161_v38 }
  0x94   :  { %v116_v33 = vpop.f32.mrf.mxu0 }
  0x95   :  { %v117_v34 = vadd.f32 %v229_v32, %v116_v33 }
  0x97   :  { %v119_v35 = vmax.f32 %v117_v34, 0.0 }
  0x99   :  { %156 = vmatmul.f32.vlgmr.msra.gmra.mxu1 %v119_v35 }
 0x116   :  { %v157_v40 = vpop.f32.mrf.mxu1 }
 0x117   :  { %v158_v41 = vadd.f32 %v230_v39, %v157_v40 }
 0x119   :  { %v160_v42 = vmax.f32 %v158_v41, 0.0 }
 0x11b   :  { %197 = vmatmul.f32.vlgmr.msra.gmra.mxu2 %v160_v42 }
 0x19e   :  { %v198_v44 = vpop.f32.mrf.mxu2 }
 0x19f   :  { %v199_v45 = vadd.f32 %v231_v43, %v198_v44 }
 0x1a1   :  { %201 = vst [vmem:[#allocation10] sm:$0xff] %v199_v45 }
 0x1a2   :  { %212 = dma.vmem_to_hbm [thread:$0]  %s208_s25, 128, %s210_s28, [#allocation4]  }
 0x1a3   :  { %358 = dma.done.wait [#allocation4], 128  }
 0x1a4   :  { %359 = vsyncadd [#allocation4], 4294967168 }
 0x1a5   :  { %217 = vsyncpa [#allocation3], 1 }
 0x1a6   :  { %218 = vsyncpa [#allocation6], 1 }
 0x1a7   :  { %219 = vsyncpa [#allocation9], 1 }
 0x1a8   :  { %220 = vsyncpa [#allocation4], 1 }

</bundles_post_ra>
